<compile_context>
chip_gen: v6e
topology: v6e:2x2x1
jax: 0.10.0
libtpu: 0.0.40
codegen_flags: <defaults>
</compile_context>

<pallas_src>
import functools

import jax
import jax.numpy as jnp
import numpy as np
from jax.experimental import pallas as pl
from jax.experimental.pallas import tpu as pltpu


def _round_up(n, m):
    return ((n + m - 1) // m) * m


# ----------------------------------------------------------------------------
# Kernel: one batch block per grid point.
#   tok_ref : (BB, T)  int32    batch-major tokens (padded rows hold token 0)
#   ptab_ref: (Vp, Hp) f32      precomputed E @ W_ih (row 0 = padding row = 0)
#   whh_ref : (Hp, Hp) bf16     = torch weight_hh_l0.T, zero-padded
#   wout_ref: (Hp, Cp) f32      = torch linear.weight.T, zero-padded
#   bout_ref: (1, Cp)  f32      = torch linear.bias, zero-padded
#   out_ref : (BB, Cp) f32      lane-dense logits (sliced to (B, C) outside)
# ----------------------------------------------------------------------------
def rnn_head_kernel(tok_ref, ptab_ref, whh_ref, wout_ref, bout_ref, out_ref):
    BB, T = tok_ref.shape
    Vp, Hp = ptab_ref.shape

    tok = tok_ref[...]                                           # (BB, T)
    ptab = ptab_ref[...]                                         # (Vp, Hp)
    lane_v = jax.lax.broadcasted_iota(jnp.int32, (BB, Vp), 1)    # vocab lanes

    # Per-step input contributions via one-hot gather matmuls.  These do NOT
    # depend on h, so they sit off the serial recurrence chain and the
    # scheduler overlaps them with the recurrence dots.
    pre = []
    for t in range(T):                        # T small & static -> unrolled
        onehot_t = (lane_v == tok[:, t:t + 1]).astype(jnp.float32)  # (BB, Vp)
        pre.append(jnp.dot(onehot_t, ptab,
                           preferred_element_type=jnp.float32))      # (BB, Hp)

    # Serial recurrence: h carried in vregs (value carry through a static
    # unrolled loop, no VMEM vst/vld on the chain).  W_hh is bf16 and
    # loop-invariant -> single-pass MXU path with the weight push hoisted;
    # accumulation stays f32.
    # TODO(synk): if the compiler does not hoist the RHS weight push, switch
    # to explicit pltpu.matmul_push_rhs / matmul_acc_lhs / matmul_pop.
    whh = whh_ref[...]                                           # (Hp, Hp) bf16
    h = jnp.zeros((BB, Hp), jnp.float32)
    for t in range(T):
        hh = jnp.dot(h.astype(jnp.bfloat16), whh,
                     preferred_element_type=jnp.float32)
        h = jnp.tanh(pre[t] + hh)

    # Final linear head (once, off the per-step chain) kept in f32.
    out_ref[...] = (
        jnp.dot(h, wout_ref[...], preferred_element_type=jnp.float32)
        + bout_ref[...]
    )


def prepare_params(emb_table, w_ih_t, w_hh_t, w_out_t, b_out):
    """Offline prep: hoist E @ W_ih and zero-pad to lane/sublane-dense shapes."""
    V, D = emb_table.shape
    H = w_ih_t.shape[1]
    C = w_out_t.shape[1]
    Vp = _round_up(V, 8)
    Hp = _round_up(H, 128)
    Cp = _round_up(C, 128)

    # Input projection is input-independent -> precompute once, full precision.
    proj = jnp.dot(emb_table, w_ih_t, precision=jax.lax.Precision.HIGHEST)
    ptab = jnp.zeros((Vp, Hp), jnp.float32).at[:V, :H].set(proj)

    # Recurrent weight in bf16 (single-pass MXU; f32 accumulation in-kernel).
    whh_p = jnp.zeros((Hp, Hp), jnp.bfloat16).at[:H, :H].set(
        w_hh_t.astype(jnp.bfloat16))
    wout_p = jnp.zeros((Hp, Cp), jnp.float32).at[:H, :C].set(w_out_t)
    bout_p = jnp.zeros((1, Cp), jnp.float32).at[0, :C].set(b_out)
    return ptab, whh_p, wout_p, bout_p


@functools.partial(jax.jit, static_argnames=("num_classes",))
def torch_model_forward(x_tokens, padded_params, *, num_classes):
    """Equivalent of TorchModel.forward(x) (inference path, y=None)."""
    ptab_p, whh_p, wout_p, bout_p = padded_params
    B, T = x_tokens.shape
    Vp, Hp = ptab_p.shape
    Cp = bout_p.shape[1]

    # Batch block per grid point: grow toward the MXU height before splitting.
    BB = min(_round_up(max(B, 8), 8), 128)
    Bp = _round_up(max(B, 8), BB)
    grid = (Bp // BB,)

    # Batch-major tokens, padded batch rows use token 0 (the padding_idx row
    # of the embedding / zero row of ptab) so they contribute nothing.
    tok = jnp.zeros((Bp, T), jnp.int32).at[:B, :].set(x_tokens.astype(jnp.int32))

    kernel = pl.pallas_call(
        rnn_head_kernel,
        out_shape=jax.ShapeDtypeStruct((Bp, Cp), jnp.float32),
        grid=grid,
        in_specs=[
            pl.BlockSpec((BB, T), lambda i: (i, 0)),       # tokens
            pl.BlockSpec((Vp, Hp), lambda i: (0, 0)),      # ptab = E @ W_ih
            pl.BlockSpec((Hp, Hp), lambda i: (0, 0)),      # W_hh (bf16)
            pl.BlockSpec((Hp, Cp), lambda i: (0, 0)),      # W_out
            pl.BlockSpec((1, Cp), lambda i: (0, 0)),       # b_out
        ],
        out_specs=pl.BlockSpec((BB, Cp), lambda i: (i, 0)),
        compiler_params=pltpu.CompilerParams(
            dimension_semantics=("parallel",)),            # v7x: 2 TCs share batch
    )
    logits_padded = kernel(tok, ptab_p, whh_p, wout_p, bout_p)
    return logits_padded[:B, :num_classes]


def reference_forward(x_tokens, params):
    """Pure-JAX f32 reference reproducing the PyTorch forward semantics."""
    emb_table, w_ih_t, w_hh_t, w_out_t, b_out = params
    embedded = jnp.take(emb_table, x_tokens, axis=0)              # (B, T, D)
    B, T, D = embedded.shape
    H = w_ih_t.shape[1]
    h = jnp.zeros((B, H), jnp.float32)
    for t in range(T):
        h = jnp.tanh(embedded[:, t, :] @ w_ih_t + h @ w_hh_t)
    return h @ w_out_t + b_out[None, :]


if __name__ == "__main__":
    # Module hyper-parameters (small, consistent with the demo).
    char_dim = 32          # embedding dim
    sentence_length = 8    # T
    hidden = 26            # nn.RNN hidden size (fixed in the module)
    vocab_size = 28        # len(vocab): 26 letters + pad + unk
    num_classes = sentence_length + 1
    batch = 4

    # Deterministic parameter init (shapes match the torch module).
    key = jax.random.PRNGKey(0)
    k_emb, k_ih, k_hh, k_lw, k_lb, k_x = jax.random.split(key, 6)

    emb_table = 0.1 * jax.random.normal(k_emb, (vocab_size, char_dim), jnp.float32)
    emb_table = emb_table.at[0].set(0.0)  # padding_idx=0 -> zero row

    # torch nn.RNN: weight_ih_l0 (H, D), weight_hh_l0 (H, H); store transposed.
    w_ih_t = 0.1 * jax.random.normal(k_ih, (char_dim, hidden), jnp.float32)
    w_hh_t = 0.1 * jax.random.normal(k_hh, (hidden, hidden), jnp.float32)
    # torch nn.Linear: weight (C, H), bias (C,); store transposed.
    w_out_t = 0.1 * jax.random.normal(k_lw, (hidden, num_classes), jnp.float32)
    b_out = 0.1 * jax.random.normal(k_lb, (num_classes,), jnp.float32)

    params = (emb_table, w_ih_t, w_hh_t, w_out_t, b_out)
    padded_params = prepare_params(*params)

    # Token inputs: integers in [1, vocab_size) (0 reserved for padding).
    x_tokens = jax.random.randint(k_x, (batch, sentence_length), 1, vocab_size,
                                  dtype=jnp.int32)

    y_pred = torch_model_forward(x_tokens, padded_params,
                                 num_classes=num_classes)
    y_pred = jax.block_until_ready(y_pred)

    # Tolerance loosened vs the pure-f32 version because the recurrence now
    # runs on the bf16 MXU path (f32 accumulation); observed error << these.
    y_ref = jax.block_until_ready(reference_forward(x_tokens, params))
    np.testing.assert_allclose(np.asarray(y_pred), np.asarray(y_ref),
                               rtol=2e-2, atol=5e-3)

    # TODO(synk): training path (nn.functional.cross_entropy on y) not kernelized;
    # only the inference forward (y=None branch) is implemented.
    print("KERNEL_OK")
</pallas_src>

<mosaic_0001>
module attributes {stable_mosaic.version = 11 : i64} {
  func.func @rnn_head_kernel(%arg0: i32, %arg1: memref<8x8xi32, #tpu.memory_space<vmem>>, %arg2: memref<32x128xf32, #tpu.memory_space<vmem>>, %arg3: memref<128x128xbf16, #tpu.memory_space<vmem>>, %arg4: memref<128x128xf32, #tpu.memory_space<vmem>>, %arg5: memref<1x128xf32, #tpu.memory_space<vmem>>, %arg6: memref<8x128xf32, #tpu.memory_space<vmem>>) attributes {dimension_semantics = [#tpu.dimension_semantics<parallel>], iteration_bounds = array<i64: 1>, scalar_prefetch = 0 : i64, scratch_operands = 0 : i64, tpu.core_type = #tpu.core_type<tc>, window_params = [{transform_indices = @transform_0, window_bounds = array<i64: 8, 8>}, {pipeline_mode = #tpu.pipeline_mode<synchronous>, transform_indices = @transform_1, window_bounds = array<i64: 32, 128>}, {pipeline_mode = #tpu.pipeline_mode<synchronous>, transform_indices = @transform_2, window_bounds = array<i64: 128, 128>}, {pipeline_mode = #tpu.pipeline_mode<synchronous>, transform_indices = @transform_3, window_bounds = array<i64: 128, 128>}, {pipeline_mode = #tpu.pipeline_mode<synchronous>, transform_indices = @transform_4, window_bounds = array<i64: 1, 128>}, {transform_indices = @transform_5, window_bounds = array<i64: 8, 128>}]} {
    %c0 = arith.constant 0 : index
    %c0_0 = arith.constant 0 : index
    %0 = vector.load %arg1[%c0, %c0_0] : memref<8x8xi32, #tpu.memory_space<vmem>>, vector<8x8xi32>
    %c0_1 = arith.constant 0 : index
    %c0_2 = arith.constant 0 : index
    %1 = vector.load %arg2[%c0_1, %c0_2] : memref<32x128xf32, #tpu.memory_space<vmem>>, vector<32x128xf32>
    %2 = tpu.iota {dimensions = array<i32: 1>} : vector<8x32xi32>
    %3 = vector.extract_strided_slice %0 {offsets = [0, 0], sizes = [8, 1], strides = [1, 1]} : vector<8x8xi32> to vector<8x1xi32>
    %4 = vector.broadcast %3 : vector<8x1xi32> to vector<8x32xi32>
    %5 = arith.cmpi eq, %2, %4 : vector<8x32xi32>
    %6 = arith.extui %5 : vector<8x32xi1> to vector<8x32xi32>
    %7 = arith.sitofp %6 : vector<8x32xi32> to vector<8x32xf32>
    %cst = arith.constant dense<0.000000e+00> : vector<8x128xf32>
    %8 = tpu.matmul %7, %1, %cst {dimension_numbers = #tpu.dot_dimension_numbers<[1], [0], [0], [1], [0, 0, 1, 1], [], []>} : vector<8x32xf32>, vector<32x128xf32>, vector<8x128xf32> -> vector<8x128xf32>
    %9 = vector.extract_strided_slice %0 {offsets = [0, 1], sizes = [8, 1], strides = [1, 1]} : vector<8x8xi32> to vector<8x1xi32>
    %10 = vector.broadcast %9 : vector<8x1xi32> to vector<8x32xi32>
    %11 = arith.cmpi eq, %2, %10 : vector<8x32xi32>
    %12 = arith.extui %11 : vector<8x32xi1> to vector<8x32xi32>
    %13 = arith.sitofp %12 : vector<8x32xi32> to vector<8x32xf32>
    %cst_3 = arith.constant dense<0.000000e+00> : vector<8x128xf32>
    %14 = tpu.matmul %13, %1, %cst_3 {dimension_numbers = #tpu.dot_dimension_numbers<[1], [0], [0], [1], [0, 0, 1, 1], [], []>} : vector<8x32xf32>, vector<32x128xf32>, vector<8x128xf32> -> vector<8x128xf32>
    %15 = vector.extract_strided_slice %0 {offsets = [0, 2], sizes = [8, 1], strides = [1, 1]} : vector<8x8xi32> to vector<8x1xi32>
    %16 = vector.broadcast %15 : vector<8x1xi32> to vector<8x32xi32>
    %17 = arith.cmpi eq, %2, %16 : vector<8x32xi32>
    %18 = arith.extui %17 : vector<8x32xi1> to vector<8x32xi32>
    %19 = arith.sitofp %18 : vector<8x32xi32> to vector<8x32xf32>
    %cst_4 = arith.constant dense<0.000000e+00> : vector<8x128xf32>
    %20 = tpu.matmul %19, %1, %cst_4 {dimension_numbers = #tpu.dot_dimension_numbers<[1], [0], [0], [1], [0, 0, 1, 1], [], []>} : vector<8x32xf32>, vector<32x128xf32>, vector<8x128xf32> -> vector<8x128xf32>
    %21 = vector.extract_strided_slice %0 {offsets = [0, 3], sizes = [8, 1], strides = [1, 1]} : vector<8x8xi32> to vector<8x1xi32>
    %22 = vector.broadcast %21 : vector<8x1xi32> to vector<8x32xi32>
    %23 = arith.cmpi eq, %2, %22 : vector<8x32xi32>
    %24 = arith.extui %23 : vector<8x32xi1> to vector<8x32xi32>
    %25 = arith.sitofp %24 : vector<8x32xi32> to vector<8x32xf32>
    %cst_5 = arith.constant dense<0.000000e+00> : vector<8x128xf32>
    %26 = tpu.matmul %25, %1, %cst_5 {dimension_numbers = #tpu.dot_dimension_numbers<[1], [0], [0], [1], [0, 0, 1, 1], [], []>} : vector<8x32xf32>, vector<32x128xf32>, vector<8x128xf32> -> vector<8x128xf32>
    %27 = vector.extract_strided_slice %0 {offsets = [0, 4], sizes = [8, 1], strides = [1, 1]} : vector<8x8xi32> to vector<8x1xi32>
    %28 = vector.broadcast %27 : vector<8x1xi32> to vector<8x32xi32>
    %29 = arith.cmpi eq, %2, %28 : vector<8x32xi32>
    %30 = arith.extui %29 : vector<8x32xi1> to vector<8x32xi32>
    %31 = arith.sitofp %30 : vector<8x32xi32> to vector<8x32xf32>
    %cst_6 = arith.constant dense<0.000000e+00> : vector<8x128xf32>
    %32 = tpu.matmul %31, %1, %cst_6 {dimension_numbers = #tpu.dot_dimension_numbers<[1], [0], [0], [1], [0, 0, 1, 1], [], []>} : vector<8x32xf32>, vector<32x128xf32>, vector<8x128xf32> -> vector<8x128xf32>
    %33 = vector.extract_strided_slice %0 {offsets = [0, 5], sizes = [8, 1], strides = [1, 1]} : vector<8x8xi32> to vector<8x1xi32>
    %34 = vector.broadcast %33 : vector<8x1xi32> to vector<8x32xi32>
    %35 = arith.cmpi eq, %2, %34 : vector<8x32xi32>
    %36 = arith.extui %35 : vector<8x32xi1> to vector<8x32xi32>
    %37 = arith.sitofp %36 : vector<8x32xi32> to vector<8x32xf32>
    %cst_7 = arith.constant dense<0.000000e+00> : vector<8x128xf32>
    %38 = tpu.matmul %37, %1, %cst_7 {dimension_numbers = #tpu.dot_dimension_numbers<[1], [0], [0], [1], [0, 0, 1, 1], [], []>} : vector<8x32xf32>, vector<32x128xf32>, vector<8x128xf32> -> vector<8x128xf32>
    %39 = vector.extract_strided_slice %0 {offsets = [0, 6], sizes = [8, 1], strides = [1, 1]} : vector<8x8xi32> to vector<8x1xi32>
    %40 = vector.broadcast %39 : vector<8x1xi32> to vector<8x32xi32>
    %41 = arith.cmpi eq, %2, %40 : vector<8x32xi32>
    %42 = arith.extui %41 : vector<8x32xi1> to vector<8x32xi32>
    %43 = arith.sitofp %42 : vector<8x32xi32> to vector<8x32xf32>
    %cst_8 = arith.constant dense<0.000000e+00> : vector<8x128xf32>
    %44 = tpu.matmul %43, %1, %cst_8 {dimension_numbers = #tpu.dot_dimension_numbers<[1], [0], [0], [1], [0, 0, 1, 1], [], []>} : vector<8x32xf32>, vector<32x128xf32>, vector<8x128xf32> -> vector<8x128xf32>
    %45 = vector.extract_strided_slice %0 {offsets = [0, 7], sizes = [8, 1], strides = [1, 1]} : vector<8x8xi32> to vector<8x1xi32>
    %46 = vector.broadcast %45 : vector<8x1xi32> to vector<8x32xi32>
    %47 = arith.cmpi eq, %2, %46 : vector<8x32xi32>
    %48 = arith.extui %47 : vector<8x32xi1> to vector<8x32xi32>
    %49 = arith.sitofp %48 : vector<8x32xi32> to vector<8x32xf32>
    %cst_9 = arith.constant dense<0.000000e+00> : vector<8x128xf32>
    %50 = tpu.matmul %49, %1, %cst_9 {dimension_numbers = #tpu.dot_dimension_numbers<[1], [0], [0], [1], [0, 0, 1, 1], [], []>} : vector<8x32xf32>, vector<32x128xf32>, vector<8x128xf32> -> vector<8x128xf32>
    %c0_10 = arith.constant 0 : index
    %c0_11 = arith.constant 0 : index
    %51 = vector.load %arg3[%c0_10, %c0_11] : memref<128x128xbf16, #tpu.memory_space<vmem>>, vector<128x128xbf16>
    %cst_12 = arith.constant 0.000000e+00 : f32
    %52 = vector.broadcast %cst_12 : f32 to vector<8x128xf32>
    %53 = arith.truncf %52 : vector<8x128xf32> to vector<8x128xbf16>
    %cst_13 = arith.constant dense<0.000000e+00> : vector<8x128xf32>
    %54 = tpu.matmul %53, %51, %cst_13 {dimension_numbers = #tpu.dot_dimension_numbers<[1], [0], [0], [1], [0, 0, 1, 1], [], []>} : vector<8x128xbf16>, vector<128x128xbf16>, vector<8x128xf32> -> vector<8x128xf32>
    %55 = arith.addf %8, %54 : vector<8x128xf32>
    %56 = math.tanh %55 : vector<8x128xf32>
    %57 = arith.truncf %56 : vector<8x128xf32> to vector<8x128xbf16>
    %cst_14 = arith.constant dense<0.000000e+00> : vector<8x128xf32>
    %58 = tpu.matmul %57, %51, %cst_14 {dimension_numbers = #tpu.dot_dimension_numbers<[1], [0], [0], [1], [0, 0, 1, 1], [], []>} : vector<8x128xbf16>, vector<128x128xbf16>, vector<8x128xf32> -> vector<8x128xf32>
    %59 = arith.addf %14, %58 : vector<8x128xf32>
    %60 = math.tanh %59 : vector<8x128xf32>
    %61 = arith.truncf %60 : vector<8x128xf32> to vector<8x128xbf16>
    %cst_15 = arith.constant dense<0.000000e+00> : vector<8x128xf32>
    %62 = tpu.matmul %61, %51, %cst_15 {dimension_numbers = #tpu.dot_dimension_numbers<[1], [0], [0], [1], [0, 0, 1, 1], [], []>} : vector<8x128xbf16>, vector<128x128xbf16>, vector<8x128xf32> -> vector<8x128xf32>
    %63 = arith.addf %20, %62 : vector<8x128xf32>
    %64 = math.tanh %63 : vector<8x128xf32>
    %65 = arith.truncf %64 : vector<8x128xf32> to vector<8x128xbf16>
    %cst_16 = arith.constant dense<0.000000e+00> : vector<8x128xf32>
    %66 = tpu.matmul %65, %51, %cst_16 {dimension_numbers = #tpu.dot_dimension_numbers<[1], [0], [0], [1], [0, 0, 1, 1], [], []>} : vector<8x128xbf16>, vector<128x128xbf16>, vector<8x128xf32> -> vector<8x128xf32>
    %67 = arith.addf %26, %66 : vector<8x128xf32>
    %68 = math.tanh %67 : vector<8x128xf32>
    %69 = arith.truncf %68 : vector<8x128xf32> to vector<8x128xbf16>
    %cst_17 = arith.constant dense<0.000000e+00> : vector<8x128xf32>
    %70 = tpu.matmul %69, %51, %cst_17 {dimension_numbers = #tpu.dot_dimension_numbers<[1], [0], [0], [1], [0, 0, 1, 1], [], []>} : vector<8x128xbf16>, vector<128x128xbf16>, vector<8x128xf32> -> vector<8x128xf32>
    %71 = arith.addf %32, %70 : vector<8x128xf32>
    %72 = math.tanh %71 : vector<8x128xf32>
    %73 = arith.truncf %72 : vector<8x128xf32> to vector<8x128xbf16>
    %cst_18 = arith.constant dense<0.000000e+00> : vector<8x128xf32>
    %74 = tpu.matmul %73, %51, %cst_18 {dimension_numbers = #tpu.dot_dimension_numbers<[1], [0], [0], [1], [0, 0, 1, 1], [], []>} : vector<8x128xbf16>, vector<128x128xbf16>, vector<8x128xf32> -> vector<8x128xf32>
    %75 = arith.addf %38, %74 : vector<8x128xf32>
    %76 = math.tanh %75 : vector<8x128xf32>
    %77 = arith.truncf %76 : vector<8x128xf32> to vector<8x128xbf16>
    %cst_19 = arith.constant dense<0.000000e+00> : vector<8x128xf32>
    %78 = tpu.matmul %77, %51, %cst_19 {dimension_numbers = #tpu.dot_dimension_numbers<[1], [0], [0], [1], [0, 0, 1, 1], [], []>} : vector<8x128xbf16>, vector<128x128xbf16>, vector<8x128xf32> -> vector<8x128xf32>
    %79 = arith.addf %44, %78 : vector<8x128xf32>
    %80 = math.tanh %79 : vector<8x128xf32>
    %81 = arith.truncf %80 : vector<8x128xf32> to vector<8x128xbf16>
    %cst_20 = arith.constant dense<0.000000e+00> : vector<8x128xf32>
    %82 = tpu.matmul %81, %51, %cst_20 {dimension_numbers = #tpu.dot_dimension_numbers<[1], [0], [0], [1], [0, 0, 1, 1], [], []>} : vector<8x128xbf16>, vector<128x128xbf16>, vector<8x128xf32> -> vector<8x128xf32>
    %83 = arith.addf %50, %82 : vector<8x128xf32>
    %84 = math.tanh %83 : vector<8x128xf32>
    %c0_21 = arith.constant 0 : index
    %c0_22 = arith.constant 0 : index
    %85 = vector.load %arg4[%c0_21, %c0_22] : memref<128x128xf32, #tpu.memory_space<vmem>>, vector<128x128xf32>
    %cst_23 = arith.constant dense<0.000000e+00> : vector<8x128xf32>
    %86 = tpu.matmul %84, %85, %cst_23 {dimension_numbers = #tpu.dot_dimension_numbers<[1], [0], [0], [1], [0, 0, 1, 1], [], []>} : vector<8x128xf32>, vector<128x128xf32>, vector<8x128xf32> -> vector<8x128xf32>
    %c0_24 = arith.constant 0 : index
    %c0_25 = arith.constant 0 : index
    %87 = vector.load %arg5[%c0_24, %c0_25] : memref<1x128xf32, #tpu.memory_space<vmem>>, vector<1x128xf32>
    %88 = vector.broadcast %87 : vector<1x128xf32> to vector<8x128xf32>
    %89 = arith.addf %86, %88 : vector<8x128xf32>
    %c0_26 = arith.constant 0 : index
    %c0_27 = arith.constant 0 : index
    %90 = vector.load %arg6[%c0_26, %c0_27] : memref<8x128xf32, #tpu.memory_space<vmem>>, vector<8x128xf32>
    tpu.vector_store %arg6[%c0_26, %c0_27], %89 {strides = array<i32>} : memref<8x128xf32, #tpu.memory_space<vmem>>, vector<8x128xf32>,
    return
  }
  func.func @transform_0(%arg0: i32) -> (i32, i32) {
    %c0_i32 = arith.constant 0 : i32
    %c0_i32_0 = arith.constant 0 : i32
    return %arg0, %c0_i32 : i32, i32
  }
  func.func @transform_1(%arg0: i32) -> (i32, i32) {
    %c0_i32 = arith.constant 0 : i32
    %c0_i32_0 = arith.constant 0 : i32
    %c0_i32_1 = arith.constant 0 : i32
    return %c0_i32, %c0_i32_0 : i32, i32
  }
  func.func @transform_2(%arg0: i32) -> (i32, i32) {
    %c0_i32 = arith.constant 0 : i32
    %c0_i32_0 = arith.constant 0 : i32
    %c0_i32_1 = arith.constant 0 : i32
    return %c0_i32, %c0_i32_0 : i32, i32
  }
  func.func @transform_3(%arg0: i32) -> (i32, i32) {
    %c0_i32 = arith.constant 0 : i32
    %c0_i32_0 = arith.constant 0 : i32
    %c0_i32_1 = arith.constant 0 : i32
    return %c0_i32, %c0_i32_0 : i32, i32
  }
  func.func @transform_4(%arg0: i32) -> (i32, i32) {
    %c0_i32 = arith.constant 0 : i32
    %c0_i32_0 = arith.constant 0 : i32
    %c0_i32_1 = arith.constant 0 : i32
    return %c0_i32, %c0_i32_0 : i32, i32
  }
  func.func @transform_5(%arg0: i32) -> (i32, i32) {
    %c0_i32 = arith.constant 0 : i32
    %c0_i32_0 = arith.constant 0 : i32
    return %arg0, %c0_i32 : i32, i32
  }
}

</mosaic_0001>

<bundles_post_ra>
// kernel: torch_model_forward.1
= control target key start
LH: loop header
LB: loop body
LE: loop exit
PB: predicated region body
PF: predicated region fallthrough
CT: control target
= control target key end

     0   :  { %10 = vsyncpa [#allocation3], 0  ;;  %s2119_s0 = inlined_call_operand.vmem [shape: s32[8,8], index: 0, kind: input, shape index: {}]   ;;  %s2120_s1 = inlined_call_operand.hbm [shape: f32[32,128], index: 1, kind: input, shape index: {}]   ;;  %s2121_s2 = inlined_call_operand.hbm [shape: bf16[128,128], index: 2, kind: input, shape index: {}]   ;;  %s2122_s3 = inlined_call_operand.hbm [shape: f32[128,128], index: 3, kind: input, shape index: {}]   ;;  %s2123_s4 = inlined_call_operand.vmem [shape: f32[1,128], index: 4, kind: input, shape index: {}]   ;;  %s2124_s5 = inlined_call_operand.vmem [shape: f32[8,128], index: 5, kind: output, shape index: {}]  }
   0x1   :  { %11 = vsyncpa [#allocation5], 0  ;;  %s1752_s18 = smov [#allocation4]  }
   0x2   :  { %s31_s19 = sshll.u32 %s1752_s18, 4  ;;  %s32_s19 = int_to_ptr.vmem [resolvable:$true] %s31_s19 }
   0x3   :  { %s1696_s20 = scalar_lea.vmem %s32_s19, 1024  ;;  %p1701_p1 = scmp.lt.s32.totalorder %s32_s19, %s32_s19 }
   0x4   :  { %p1697_p0 = scmp.ne.s32.totalorder %s32_s19, %s1696_s20  ;;  %p1702_p2 = scmp.lt.s32.totalorder %s1696_s20, %s1696_s20 }
   0x6   :  { %p1703_p3 = por %p1702_p2, %p1701_p1 }
   0x8   :  { %p1704_p4 = pnand %p1703_p3, %p1697_p0 }
   0xa   :  { %1707 = shalt.err (!%p1704_p4)
}
   0xb   :  { %s1753_s21 = smov 64   ;;  %s1754_s22 = smov 4  }
   0xc   :  { %37 = dma.hbm_to_vmem [thread:$0]  %s2121_s2, 1024, %s32_s19, [#allocation5], %s1753_s21, %s1753_s21, %s1754_s22  }
   0xd   :  { %s1755_s25 = smov [#allocation2]  }
   0xe   :  { %s19_s26 = sshll.u32 %s1755_s25, 4  ;;  %s20_s26 = int_to_ptr.vmem [resolvable:$true] %s19_s26 }
   0xf   :  { %s1716_s27 = scalar_lea.vmem %s20_s26, 512  ;;  %p1721_p6 = scmp.lt.s32.totalorder %s20_s26, %s20_s26 }
  0x10   :  { %p1717_p5 = scmp.ne.s32.totalorder %s20_s26, %s1716_s27  ;;  %p1722_p7 = scmp.lt.s32.totalorder %s1716_s27, %s1716_s27 }
  0x12   :  { %p1723_p8 = por %p1722_p7, %p1721_p6 }
  0x14   :  { %p1724_p9 = pnand %p1723_p8, %p1717_p5 }
  0x16   :  { %1727 = shalt.err (!%p1724_p9)
}
  0x17   :  { %s1756_s28 = smov 128   ;;  %s1757_s29 = smov 8  }
  0x18   :  { %25 = dma.hbm_to_vmem [thread:$0]  %s2120_s1, 512, %s20_s26, [#allocation3], %s1756_s28, %s1756_s28, %s1757_s29  }
  0x19   :  { %s1758_s7 = smov [#allocation6]  }
  0x1a   :  { %s43_s8 = sshll.u32 %s1758_s7, 4  ;;  %s44_s8 = int_to_ptr.vmem [resolvable:$true] %s43_s8 }
  0x1b   :  { %s1736_s2 = scalar_lea.vmem %s44_s8, 2048  ;;  %p1741_p11 = scmp.lt.s32.totalorder %s44_s8, %s44_s8 }
  0x1c   :  { %p1737_p10 = scmp.ne.s32.totalorder %s44_s8, %s1736_s2  ;;  %p1742_p12 = scmp.lt.s32.totalorder %s1736_s2, %s1736_s2 }
  0x1e   :  { %p1743_p13 = por %p1742_p12, %p1741_p11 }
  0x20   :  { %p1744_p0 = pnand %p1743_p13, %p1737_p10 }
  0x22   :  { %1747 = shalt.err (!%p1744_p0)
}
  0x23   :  { %49 = dma.hbm_to_vmem [thread:$0]  %s2122_s3, 2048, %s44_s8, [#allocation5], %s1756_s28, %s1756_s28, %s1757_s29  }
  0x24   :  { %1748 = dma.done.wait [#allocation3], 512  }
  0x25   :  { %1749 = vsyncadd [#allocation3], 4294966784 }
  0x26   :  { %1750 = dma.done.wait [#allocation5], 3072  }
  0x27   :  { %1751 = vsyncadd [#allocation5], 4294964224  ;;  %v1759_v0 = vmov 0   ;;  %v1760_v1 = vmov 0.0   ;;  %vm1761_vm0 = vmmov 0   ;;  %v1817_v2 = vld [vmem:[%s2119_s0] sm:$0xff]  ;;  %v67_v16 = vlaneseq }
  0x28   :  { %1655 = vset.pattern.permute.xlu0 %v1759_v0  ;;  %1355 = vmatprep.subr.bf16.mxu0 %v1760_v1  ;;  %v1820_v3 = vld [vmem:[#allocation4 + $0x38] sm:$0xff]   ;;  %v1823_v4 = vld [vmem:[#allocation4 + $0x30] sm:$0xff]   ;;  %v1762_v5 = vmov 1   ;;  %v1828_v6 = vld [vmem:[#allocation4 + $0x28] sm:$0xff]   ;;  %vm221_vm1 = vcmask 261120   ;;  %v1763_v20 = vmov 2  }
  0x29   :  { %1375 = vmatprep.subr.mxu1 %v1760_v1  ;;  %1371 = vmatprep.mubr.msk.bf16.mxu0 %vm1761_vm0, %v1760_v1  ;;  %v1831_v7 = vld [vmem:[#allocation2 + $0x18] sm:$0xff]  ;;  %v1833_v8 = vld [vmem:[#allocation2 + $0x10] sm:$0xff]  ;;  %v1837_v9 = vld [vmem:[#allocation2 + $0x8] sm:$0xff]  ;;  %v1887_v17 = vand.u32 127, %v67_v16  ;;  %v1764_v34 = vmov 3   ;;  %v1765_v48 = vmov 4  }
  0x2a   :  { %1383 = vmatprep.mubr.msk.f32.mxu1 %vm1761_vm0, %v1760_v1  ;;  %70 = vperm.xlu0 %1655, %v1817_v2   ;;  %v1840_v10 = vld [vmem:[#allocation4 + $0x20] sm:$0xff]   ;;  %v1850_v12 = vld [vmem:[#allocation4 + $0x18] sm:$0xff]   ;;  %v1856_v13 = vld [vmem:[#allocation4 + $0x10] sm:$0xff]   ;;  %v1766_v60 = vmov 5  }
  0x2b   :  { %1356 = vmatpush3.bf16.msra.mxu0 %v1820_v3  ;;  %1376 = vmatpush3.msra.mxu1 %v1831_v7  ;;  %v1845_v11 = vld [vmem:[#allocation2] sm:$0xff]  ;;  %v1860_v14 = vld [vmem:[#allocation4 + $0x8] sm:$0xff]  }
  0x2c   :  { %1357 = vmatprep.subr.bf16.mxu0 %v1760_v1  ;;  %1377 = vmatprep.subr.mxu1 %v1760_v1  ;;  %v1864_v15 = vld [vmem:[#allocation4] sm:$0xff]  }
  0x2d   :  { %1378 = vmatpush3.msra.mxu1 %v1833_v8  ;;  %1657 = vset.pattern.permute.xlu1 %v1763_v20 }
  0x2e   :  { %1656 = vset.pattern.permute.xlu0 %v1762_v5  ;;  %1379 = vmatprep.subr.mxu1 %v1760_v1 }
  0x2f   :  { %76 = vperm.xlu0 %1656, %v1817_v2   ;;  %1358 = vmatpush3.bf16.msra.mxu0 %v1823_v4 }
  0x30   :  { %1359 = vmatprep.subr.bf16.mxu0 %v1760_v1  ;;  %1380 = vmatpush3.msra.mxu1 %v1837_v9 }
  0x31   :  { %1381 = vmatprep.subr.mxu1 %v1760_v1  ;;  %82 = vperm.xlu1 %1657, %v1817_v2  }
  0x32   :  { %1382 = vmatpush3.msra.mxu1 %v1845_v11 }
  0x33   :  { %1360 = vmatpush3.bf16.msra.mxu0 %v1828_v6  ;;  %1386 = vmatprep.subr.bf16.mxu1 %v1760_v1 }
  0x34   :  { %1361 = vmatprep.subr.bf16.mxu0 %v1760_v1  ;;  %1660 = vset.pattern.permute.xlu0 %v1766_v60 }
  0x35   :  { %1658 = vset.pattern.permute.xlu1 %v1764_v34  ;;  %100 = vperm.xlu0 %1660, %v1817_v2  }
  0x36   :  { %88 = vperm.xlu1 %1658, %v1817_v2  }
  0x37   :  { %1362 = vmatpush3.bf16.msra.mxu0 %v1840_v10 }
  0x38   :  { %1363 = vmatprep.subr.bf16.mxu0 %v1760_v1 }
  0x3a   :  { %1659 = vset.pattern.permute.xlu1 %v1765_v48  ;;  %v1112_v48 = vld [vmem:[#allocation6 + $0x58] sm:$0xff] }
  0x3b   :  { %1364 = vmatpush3.bf16.msra.mxu0 %v1850_v12  ;;  %94 = vperm.xlu1 %1659, %v1817_v2  }
  0x3c   :  { %1365 = vmatprep.subr.bf16.mxu0 %v1760_v1 }
  0x3f   :  { %1366 = vmatpush3.bf16.msra.mxu0 %v1856_v13 }
  0x40   :  { %1367 = vmatprep.subr.bf16.mxu0 %v1760_v1 }
  0x43   :  { %1368 = vmatpush3.bf16.msra.mxu0 %v1860_v14 }
  0x44   :  { %1369 = vmatprep.subr.bf16.mxu0 %v1760_v1 }
  0x47   :  { %1370 = vmatpush3.bf16.msra.mxu0 %v1864_v15 }
  0x48   :  { %1417 = vmatprep.subr.bf16.mxu0 %v1760_v1 }
  0x4a   :  { %1372 = vmatmul.mubr.bf16.vlgmr.msra.gmra.mxu0 %v1759_v0 }
  0x4b   :  { %1418 = vmatpush3.bf16.msra.mxu0 %v1820_v3  ;;  %1433 = vmatprep.mubr.msk.bf16.mxu0 %vm1761_vm0, %v1760_v1 }
  0x4c   :  { %1419 = vmatprep.subr.bf16.mxu0 %v1760_v1 }
  0x4f   :  { %1420 = vmatpush3.bf16.msra.mxu0 %v1823_v4 }
  0x50   :  { %1421 = vmatprep.subr.bf16.mxu0 %v1760_v1 }
  0x53   :  { %1422 = vmatpush3.bf16.msra.mxu0 %v1828_v6 }
  0x54   :  { %1423 = vmatprep.subr.bf16.mxu0 %v1760_v1 }
  0x57   :  { %1424 = vmatpush3.bf16.msra.mxu0 %v1840_v10 }
  0x58   :  { %1425 = vmatprep.subr.bf16.mxu0 %v1760_v1 }
  0x5b   :  { %1426 = vmatpush3.bf16.msra.mxu0 %v1850_v12 }
  0x5c   :  { %1427 = vmatprep.subr.bf16.mxu0 %v1760_v1 }
  0x5f   :  { %1428 = vmatpush3.bf16.msra.mxu0 %v1856_v13 }
  0x60   :  { %1429 = vmatprep.subr.bf16.mxu0 %v1760_v1 }
  0x63   :  { %1430 = vmatpush3.bf16.msra.mxu0 %v1860_v14 }
  0x64   :  { %1431 = vmatprep.subr.bf16.mxu0 %v1760_v1 }
  0x67   :  { %1432 = vmatpush3.bf16.msra.mxu0 %v1864_v15 }
  0x68   :  { %1468 = vmatprep.subr.mxu0 %v1760_v1 }
  0xa5   :  { %v71_v18 = vpop.permute.xlu0 %70 }
  0xa6   :  { %vm72_vm2 = vcmp.eq.s32.totalorder %v1887_v17, %v71_v18 }
  0xa7   :  { %v1201_v19 = vsel %vm72_vm2, 1.0, %v1760_v1 }
  0xa8   :  { %1384 = vmatmul.mubr.msk.f32.vlgmr.msra.gmra.mxu1 %vm221_vm1, %v1201_v19 }
  0xa9   :  { %1387 = vmatpush3.bf16.msra.mxu1 %v1820_v3  ;;  %1402 = vmatprep.mubr.msk.bf16.mxu1 %vm1761_vm0, %v1760_v1 }
  0xaa   :  { %1388 = vmatprep.subr.bf16.mxu1 %v1760_v1  ;;  %v77_v30 = vpop.permute.xlu0 %76 }
  0xab   :  { %vm78_vm3 = vcmp.eq.s32.totalorder %v1887_v17, %v77_v30 }
  0xac   :  { %v1202_v31 = vsel %vm78_vm3, 1.0, %v1760_v1  ;;  %v83_v32 = vpop.permute.xlu1 %82 }
  0xad   :  { %1389 = vmatpush3.bf16.msra.mxu1 %v1823_v4  ;;  %vm84_vm4 = vcmp.eq.s32.totalorder %v1887_v17, %v83_v32 }
  0xae   :  { %1390 = vmatprep.subr.bf16.mxu1 %v1760_v1  ;;  %v1203_v33 = vsel %vm84_vm4, 1.0, %v1760_v1 }
  0xb1   :  { %1391 = vmatpush3.bf16.msra.mxu1 %v1828_v6  ;;  %v89_v46 = vpop.permute.xlu1 %88 }
  0xb2   :  { %1392 = vmatprep.subr.bf16.mxu1 %v1760_v1  ;;  %vm90_vm5 = vcmp.eq.s32.totalorder %v1887_v17, %v89_v46 }
  0xb3   :  { %v1204_v47 = vsel %vm90_vm5, 1.0, %v1760_v1 }
  0xb5   :  { %1393 = vmatpush3.bf16.msra.mxu1 %v1840_v10 }
  0xb6   :  { %1394 = vmatprep.subr.bf16.mxu1 %v1760_v1  ;;  %v95_v58 = vpop.permute.xlu1 %94 }
  0xb7   :  { %vm96_vm6 = vcmp.eq.s32.totalorder %v1887_v17, %v95_v58 }
  0xb8   :  { %v1205_v59 = vsel %vm96_vm6, 1.0, %v1760_v1 }
  0xb9   :  { %1395 = vmatpush3.bf16.msra.mxu1 %v1850_v12 }
  0xba   :  { %1396 = vmatprep.subr.bf16.mxu1 %v1760_v1 }
  0xbd   :  { %1397 = vmatpush3.bf16.msra.mxu1 %v1856_v13 }
  0xbe   :  { %1398 = vmatprep.subr.bf16.mxu1 %v1760_v1 }
  0xc1   :  { %1399 = vmatpush3.bf16.msra.mxu1 %v1860_v14 }
  0xc2   :  { %1400 = vmatprep.subr.bf16.mxu1 %v1760_v1 }
  0xc5   :  { %1401 = vmatpush3.bf16.msra.mxu1 %v1864_v15 }
  0xc6   :  { %1406 = vmatprep.subr.mxu1 %v1760_v1 }
 0x10a   :  { %v215_v21 = vpop.f32.mrf.mxu0 }
 0x10c   :  { %v1373_v22 = vpop.f32.mrf.mxu0 }
 0x10e   :  { %v218_v23 = vpop.f32.mrf.mxu0 }
 0x10f   :  { %v1767_v23 = vmov 6  }
 0x110   :  { %v1374_v24 = vpop.f32.mrf.mxu0  ;;  %1661 = vset.pattern.permute.xlu1 %v1767_v23 }
 0x111   :  { %106 = vperm.xlu1 %1661, %v1817_v2  }
 0x168   :  { %v291_v25 = vpop.f32.mrf.mxu1 }
 0x169   :  { %v292_v26 = vadd.f32 %v291_v25, %v215_v21  ;;  %v101_v21 = vpop.permute.xlu0 %100 }
 0x16a   :  { %v1385_v27 = vpop.f32.mrf.mxu1  ;;  %vm102_vm7 = vcmp.eq.s32.totalorder %v1887_v17, %v101_v21 }
 0x16b   :  { %1672 = vtanh.f32 %v292_v26  ;;  %v1206_v22 = vsel %vm102_vm7, 1.0, %v1760_v1 }
 0x178   :  { %v1673_v28 = vpop.eup %1672 }
 0x179   :  { %v296_v29 = vpack.c.bf16 %v1673_v28, %v1673_v28 }
 0x17b   :  { %1403 = vmatmul.mubr.bf16.vlgmr.msra.gmra.mxu1 %v296_v29 }
 0x17c   :  { %1407 = vmatpush3.msra.mxu1 %v1831_v7  ;;  %1414 = vmatprep.mubr.msk.f32.mxu1 %vm1761_vm0, %v1760_v1 }
 0x17d   :  { %1408 = vmatprep.subr.mxu1 %v1760_v1 }
 0x17e   :  { %1409 = vmatpush3.msra.mxu1 %v1833_v8 }
 0x17f   :  { %1410 = vmatprep.subr.mxu1 %v1760_v1 }
 0x180   :  { %1411 = vmatpush3.msra.mxu1 %v1837_v9 }
 0x181   :  { %1412 = vmatprep.subr.mxu1 %v1760_v1 }
 0x182   :  { %1413 = vmatpush3.msra.mxu1 %v1845_v11 }
 0x183   :  { %1415 = vmatmul.mubr.msk.f32.vlgmr.msra.gmra.mxu1 %vm221_vm1, %v1202_v31  ;;  %1437 = vmatprep.subr.mxu1 %v1760_v1 }
 0x184   :  { %1438 = vmatpush3.msra.mxu1 %v1831_v7  ;;  %1445 = vmatprep.mubr.msk.f32.mxu1 %vm1761_vm0, %v1760_v1 }
 0x185   :  { %1439 = vmatprep.subr.mxu1 %v1760_v1 }
 0x186   :  { %1440 = vmatpush3.msra.mxu1 %v1833_v8 }
 0x187   :  { %1441 = vmatprep.subr.mxu1 %v1760_v1 }
 0x188   :  { %1442 = vmatpush3.msra.mxu1 %v1837_v9 }
 0x189   :  { %1443 = vmatprep.subr.mxu1 %v1760_v1 }
 0x18a   :  { %1444 = vmatpush3.msra.mxu1 %v1845_v11 }
 0x18b   :  { %1448 = vmatprep.subr.bf16.mxu1 %v1760_v1  ;;  %1446 = vmatmul.mubr.msk.f32.vlgmr.msra.gmra.mxu1 %vm221_vm1, %v1203_v33 }
 0x18c   :  { %1449 = vmatpush3.bf16.msra.mxu1 %v1820_v3  ;;  %1464 = vmatprep.mubr.msk.bf16.mxu1 %vm1761_vm0, %v1760_v1  ;;  %v107_v33 = vpop.permute.xlu1 %106 }
 0x18d   :  { %1450 = vmatprep.subr.bf16.mxu1 %v1760_v1  ;;  %vm108_vm8 = vcmp.eq.s32.totalorder %v1887_v17, %v107_v33 }
 0x18e   :  { %v1207_v34 = vsel %vm108_vm8, 1.0, %v1760_v1 }
 0x190   :  { %1451 = vmatpush3.bf16.msra.mxu1 %v1823_v4 }
 0x191   :  { %1452 = vmatprep.subr.bf16.mxu1 %v1760_v1 }
 0x194   :  { %1453 = vmatpush3.bf16.msra.mxu1 %v1828_v6 }
 0x195   :  { %1454 = vmatprep.subr.bf16.mxu1 %v1760_v1 }
 0x198   :  { %1455 = vmatpush3.bf16.msra.mxu1 %v1840_v10 }
 0x199   :  { %1456 = vmatprep.subr.bf16.mxu1 %v1760_v1 }
 0x19c   :  { %1457 = vmatpush3.bf16.msra.mxu1 %v1850_v12 }
 0x19d   :  { %1458 = vmatprep.subr.bf16.mxu1 %v1760_v1 }
 0x1a0   :  { %1459 = vmatpush3.bf16.msra.mxu1 %v1856_v13 }
 0x1a1   :  { %1460 = vmatprep.subr.bf16.mxu1 %v1760_v1 }
 0x1a4   :  { %1461 = vmatpush3.bf16.msra.mxu1 %v1860_v14 }
 0x1a5   :  { %1462 = vmatprep.subr.bf16.mxu1 %v1760_v1 }
 0x1a8   :  { %1463 = vmatpush3.bf16.msra.mxu1 %v1864_v15 }
 0x1a9   :  { %1499 = vmatprep.subr.mxu1 %v1760_v1 }
 0x23b   :  { %v331_v35 = vpop.f32.mrf.mxu1 }
 0x23d   :  { %v1404_v36 = vpop.f32.mrf.mxu1 }
 0x23f   :  { %v334_v37 = vpop.f32.mrf.mxu1 }
 0x240   :  { %v1116_v37 = vld [vmem:[#allocation6 + $0x78] sm:$0xff] }
 0x241   :  { %v1405_v38 = vpop.f32.mrf.mxu1 }
 0x242   :  { %v1115_v38 = vld [vmem:[#allocation6 + $0x70] sm:$0xff] }
 0x243   :  { %v406_v39 = vpop.f32.mrf.mxu1 }
 0x244   :  { %v407_v40 = vadd.f32 %v406_v39, %v331_v35  ;;  %v1768_v35 = vmov 7  }
 0x245   :  { %v1416_v41 = vpop.f32.mrf.mxu1  ;;  %1662 = vset.pattern.permute.xlu1 %v1768_v35  ;;  %1663 = vset.pattern.permute.xlu0 %v1768_v35 }
 0x246   :  { %1674 = vtanh.f32 %v407_v40  ;;  %112 = vperm.xlu1 %1662, %v1817_v2  }
 0x24b   :  { %v521_v44 = vpop.f32.mrf.mxu1 }
 0x24d   :  { %v1447_v45 = vpop.f32.mrf.mxu1 }
 0x253   :  { %v1675_v42 = vpop.eup %1674 }
 0x254   :  { %v411_v43 = vpack.c.bf16 %v1675_v42, %v1675_v42 }
 0x256   :  { %1434 = vmatmul.mubr.bf16.vlgmr.msra.gmra.mxu0 %v411_v43 }
 0x257   :  { %1469 = vmatpush3.msra.mxu0 %v1831_v7  ;;  %1476 = vmatprep.mubr.msk.f32.mxu0 %vm1761_vm0, %v1760_v1 }
 0x258   :  { %1470 = vmatprep.subr.mxu0 %v1760_v1 }
 0x259   :  { %1471 = vmatpush3.msra.mxu0 %v1833_v8 }
 0x25a   :  { %1472 = vmatprep.subr.mxu0 %v1760_v1 }
 0x25b   :  { %1473 = vmatpush3.msra.mxu0 %v1837_v9 }
 0x25c   :  { %1474 = vmatprep.subr.mxu0 %v1760_v1 }
 0x25d   :  { %1475 = vmatpush3.msra.mxu0 %v1845_v11 }
 0x25e   :  { %1479 = vmatprep.subr.bf16.mxu0 %v1760_v1  ;;  %1477 = vmatmul.mubr.msk.f32.vlgmr.msra.gmra.mxu0 %vm221_vm1, %v1204_v47 }
 0x25f   :  { %1480 = vmatpush3.bf16.msra.mxu0 %v1820_v3  ;;  %1495 = vmatprep.mubr.msk.bf16.mxu0 %vm1761_vm0, %v1760_v1 }
 0x260   :  { %1481 = vmatprep.subr.bf16.mxu0 %v1760_v1 }
 0x263   :  { %1482 = vmatpush3.bf16.msra.mxu0 %v1823_v4 }
 0x264   :  { %1483 = vmatprep.subr.bf16.mxu0 %v1760_v1 }
 0x267   :  { %1484 = vmatpush3.bf16.msra.mxu0 %v1828_v6 }
 0x268   :  { %1485 = vmatprep.subr.bf16.mxu0 %v1760_v1 }
 0x26b   :  { %1486 = vmatpush3.bf16.msra.mxu0 %v1840_v10 }
 0x26c   :  { %1487 = vmatprep.subr.bf16.mxu0 %v1760_v1 }
 0x26f   :  { %1488 = vmatpush3.bf16.msra.mxu0 %v1850_v12 }
 0x270   :  { %1489 = vmatprep.subr.bf16.mxu0 %v1760_v1 }
 0x273   :  { %1490 = vmatpush3.bf16.msra.mxu0 %v1856_v13 }
 0x274   :  { %1491 = vmatprep.subr.bf16.mxu0 %v1760_v1 }
 0x277   :  { %1492 = vmatpush3.bf16.msra.mxu0 %v1860_v14 }
 0x278   :  { %1493 = vmatprep.subr.bf16.mxu0 %v1760_v1 }
 0x27b   :  { %1494 = vmatpush3.bf16.msra.mxu0 %v1864_v15 }
 0x27c   :  { %1530 = vmatprep.subr.mxu0 %v1760_v1 }
 0x2c1   :  { %v113_v46 = vpop.permute.xlu1 %112 }
 0x2c2   :  { %vm114_vm9 = vcmp.eq.s32.totalorder %v1887_v17, %v113_v46  ;;  %v1109_v17 = vld [vmem:[#allocation6 + $0x40] sm:$0xff] }
 0x2c3   :  { %v1208_v47 = vsel %vm114_vm9, 1.0, %v1760_v1 }
 0x316   :  { %v446_v49 = vpop.f32.mrf.mxu0 }
 0x317   :  { %v522_v50 = vadd.f32 %v521_v44, %v446_v49  ;;  %v1107_v49 = vld [vmem:[#allocation6 + $0x30] sm:$0xff] }
 0x318   :  { %v1435_v51 = vpop.f32.mrf.mxu0 }
 0x319   :  { %1676 = vtanh.f32 %v522_v50  ;;  %v1106_v50 = vld [vmem:[#allocation6 + $0x28] sm:$0xff]  ;;  %v1105_v51 = vld [vmem:[#allocation6 + $0x20] sm:$0xff] }
 0x31a   :  { %v449_v52 = vpop.f32.mrf.mxu0 }
 0x31b   :  { %v1104_v52 = vld [vmem:[#allocation6 + $0x18] sm:$0xff] }
 0x31c   :  { %v1436_v53 = vpop.f32.mrf.mxu0 }
 0x31d   :  { %v1103_v53 = vld [vmem:[#allocation6 + $0x10] sm:$0xff] }
 0x31e   :  { %v636_v56 = vpop.f32.mrf.mxu0 }
 0x320   :  { %v1478_v57 = vpop.f32.mrf.mxu0 }
 0x326   :  { %v1677_v54 = vpop.eup %1676 }
 0x327   :  { %v526_v55 = vpack.c.bf16 %v1677_v54, %v1677_v54  ;;  %v1102_v54 = vld [vmem:[#allocation6 + $0x8] sm:$0xff] }
 0x329   :  { %1465 = vmatmul.mubr.bf16.vlgmr.msra.gmra.mxu1 %v526_v55  ;;  %v1101_v55 = vld [vmem:[#allocation6] sm:$0xff] }
 0x32a   :  { %1500 = vmatpush3.msra.mxu1 %v1831_v7  ;;  %1507 = vmatprep.mubr.msk.f32.mxu1 %vm1761_vm0, %v1760_v1 }
 0x32b   :  { %1501 = vmatprep.subr.mxu1 %v1760_v1 }
 0x32c   :  { %1502 = vmatpush3.msra.mxu1 %v1833_v8 }
 0x32d   :  { %1503 = vmatprep.subr.mxu1 %v1760_v1 }
 0x32e   :  { %1504 = vmatpush3.msra.mxu1 %v1837_v9 }
 0x32f   :  { %1505 = vmatprep.subr.mxu1 %v1760_v1 }
 0x330   :  { %1506 = vmatpush3.msra.mxu1 %v1845_v11 }
 0x331   :  { %1510 = vmatprep.subr.bf16.mxu1 %v1760_v1  ;;  %1508 = vmatmul.mubr.msk.f32.vlgmr.msra.gmra.mxu1 %vm221_vm1, %v1205_v59 }
 0x332   :  { %1511 = vmatpush3.bf16.msra.mxu1 %v1820_v3  ;;  %1526 = vmatprep.mubr.msk.bf16.mxu1 %vm1761_vm0, %v1760_v1 }
 0x333   :  { %1512 = vmatprep.subr.bf16.mxu1 %v1760_v1 }
 0x336   :  { %1513 = vmatpush3.bf16.msra.mxu1 %v1823_v4 }
 0x337   :  { %1514 = vmatprep.subr.bf16.mxu1 %v1760_v1 }
 0x33a   :  { %1515 = vmatpush3.bf16.msra.mxu1 %v1828_v6 }
 0x33b   :  { %1516 = vmatprep.subr.bf16.mxu1 %v1760_v1 }
 0x33e   :  { %1517 = vmatpush3.bf16.msra.mxu1 %v1840_v10 }
 0x33f   :  { %1518 = vmatprep.subr.bf16.mxu1 %v1760_v1 }
 0x342   :  { %1519 = vmatpush3.bf16.msra.mxu1 %v1850_v12 }
 0x343   :  { %1520 = vmatprep.subr.bf16.mxu1 %v1760_v1 }
 0x346   :  { %1521 = vmatpush3.bf16.msra.mxu1 %v1856_v13 }
 0x347   :  { %1522 = vmatprep.subr.bf16.mxu1 %v1760_v1 }
 0x34a   :  { %1523 = vmatpush3.bf16.msra.mxu1 %v1860_v14 }
 0x34b   :  { %1524 = vmatprep.subr.bf16.mxu1 %v1760_v1 }
 0x34e   :  { %1525 = vmatpush3.bf16.msra.mxu1 %v1864_v15 }
 0x34f   :  { %1561 = vmatprep.subr.mxu1 %v1760_v1 }
 0x3e9   :  { %v561_v61 = vpop.f32.mrf.mxu1 }
 0x3ea   :  { %v637_v62 = vadd.f32 %v636_v56, %v561_v61 }
 0x3eb   :  { %v1466_v63 = vpop.f32.mrf.mxu1 }
 0x3ec   :  { %1678 = vtanh.f32 %v637_v62 }
 0x3ed   :  { %v564_v0 = vpop.f32.mrf.mxu1 }
 0x3ee   :  { %v1225_v0 = vld [vmem:[%s2123_s4] ss:$0 sm:$0xff] }
 0x3ef   :  { %v1467_v5 = vpop.f32.mrf.mxu1 }
 0x3f1   :  { %v751_v19 = vpop.f32.mrf.mxu1 }
 0x3f3   :  { %v1509_v20 = vpop.f32.mrf.mxu1 }
 0x3f9   :  { %v1679_v16 = vpop.eup %1678 }
 0x3fa   :  { %v641_v18 = vpack.c.bf16 %v1679_v16, %v1679_v16 }
 0x3fc   :  { %1496 = vmatmul.mubr.bf16.vlgmr.msra.gmra.mxu0 %v641_v18 }
 0x3fd   :  { %1531 = vmatpush3.msra.mxu0 %v1831_v7  ;;  %1538 = vmatprep.mubr.msk.f32.mxu0 %vm1761_vm0, %v1760_v1 }
 0x3fe   :  { %1532 = vmatprep.subr.mxu0 %v1760_v1 }
 0x3ff   :  { %1533 = vmatpush3.msra.mxu0 %v1833_v8 }
 0x400   :  { %1534 = vmatprep.subr.mxu0 %v1760_v1 }
 0x401   :  { %1535 = vmatpush3.msra.mxu0 %v1837_v9 }
 0x402   :  { %1536 = vmatprep.subr.mxu0 %v1760_v1 }
 0x403   :  { %1537 = vmatpush3.msra.mxu0 %v1845_v11 }
 0x404   :  { %1541 = vmatprep.subr.bf16.mxu0 %v1760_v1  ;;  %1539 = vmatmul.mubr.msk.f32.vlgmr.msra.gmra.mxu0 %vm221_vm1, %v1206_v22 }
 0x405   :  { %1542 = vmatpush3.bf16.msra.mxu0 %v1820_v3  ;;  %1557 = vmatprep.mubr.msk.bf16.mxu0 %vm1761_vm0, %v1760_v1 }
 0x406   :  { %1543 = vmatprep.subr.bf16.mxu0 %v1760_v1 }
 0x409   :  { %1544 = vmatpush3.bf16.msra.mxu0 %v1823_v4 }
 0x40a   :  { %1545 = vmatprep.subr.bf16.mxu0 %v1760_v1 }
 0x40d   :  { %1546 = vmatpush3.bf16.msra.mxu0 %v1828_v6 }
 0x40e   :  { %1547 = vmatprep.subr.bf16.mxu0 %v1760_v1 }
 0x411   :  { %1548 = vmatpush3.bf16.msra.mxu0 %v1840_v10 }
 0x412   :  { %1549 = vmatprep.subr.bf16.mxu0 %v1760_v1 }
 0x415   :  { %1550 = vmatpush3.bf16.msra.mxu0 %v1850_v12 }
 0x416   :  { %1551 = vmatprep.subr.bf16.mxu0 %v1760_v1 }
 0x419   :  { %1552 = vmatpush3.bf16.msra.mxu0 %v1856_v13 }
 0x41a   :  { %1553 = vmatprep.subr.bf16.mxu0 %v1760_v1 }
 0x41d   :  { %1554 = vmatpush3.bf16.msra.mxu0 %v1860_v14 }
 0x41e   :  { %1555 = vmatprep.subr.bf16.mxu0 %v1760_v1 }
 0x421   :  { %1556 = vmatpush3.bf16.msra.mxu0 %v1864_v15 }
 0x422   :  { %1603 = vmatprep.subr.mxu0 %v1760_v1 }
 0x4bc   :  { %v676_v24 = vpop.f32.mrf.mxu0 }
 0x4bd   :  { %v752_v25 = vadd.f32 %v751_v19, %v676_v24 }
 0x4be   :  { %v1497_v26 = vpop.f32.mrf.mxu0 }
 0x4bf   :  { %1680 = vtanh.f32 %v752_v25 }
 0x4c0   :  { %v679_v27 = vpop.f32.mrf.mxu0 }
 0x4c2   :  { %v1498_v28 = vpop.f32.mrf.mxu0 }
 0x4c4   :  { %v866_v31 = vpop.f32.mrf.mxu0 }
 0x4c6   :  { %v1540_v32 = vpop.f32.mrf.mxu0 }
 0x4cc   :  { %v1681_v29 = vpop.eup %1680 }
 0x4cd   :  { %v756_v30 = vpack.c.bf16 %v1681_v29, %v1681_v29 }
 0x4cf   :  { %1527 = vmatmul.mubr.bf16.vlgmr.msra.gmra.mxu1 %v756_v30 }
 0x4d0   :  { %1562 = vmatpush3.msra.mxu1 %v1831_v7  ;;  %1569 = vmatprep.mubr.msk.f32.mxu1 %vm1761_vm0, %v1760_v1 }
 0x4d1   :  { %1563 = vmatprep.subr.mxu1 %v1760_v1 }
 0x4d2   :  { %1564 = vmatpush3.msra.mxu1 %v1833_v8 }
 0x4d3   :  { %1565 = vmatprep.subr.mxu1 %v1760_v1 }
 0x4d4   :  { %1566 = vmatpush3.msra.mxu1 %v1837_v9 }
 0x4d5   :  { %1567 = vmatprep.subr.mxu1 %v1760_v1 }
 0x4d6   :  { %1568 = vmatpush3.msra.mxu1 %v1845_v11 }
 0x4d7   :  { %1572 = vmatprep.subr.bf16.mxu1 %v1760_v1  ;;  %1570 = vmatmul.mubr.msk.f32.vlgmr.msra.gmra.mxu1 %vm221_vm1, %v1207_v34 }
 0x4d8   :  { %1573 = vmatpush3.bf16.msra.mxu1 %v1820_v3  ;;  %1588 = vmatprep.mubr.msk.bf16.mxu1 %vm1761_vm0, %v1760_v1 }
 0x4d9   :  { %1574 = vmatprep.subr.bf16.mxu1 %v1760_v1 }
 0x4dc   :  { %1575 = vmatpush3.bf16.msra.mxu1 %v1823_v4 }
 0x4dd   :  { %1576 = vmatprep.subr.bf16.mxu1 %v1760_v1 }
 0x4e0   :  { %1577 = vmatpush3.bf16.msra.mxu1 %v1828_v6 }
 0x4e1   :  { %1578 = vmatprep.subr.bf16.mxu1 %v1760_v1 }
 0x4e4   :  { %1579 = vmatpush3.bf16.msra.mxu1 %v1840_v10 }
 0x4e5   :  { %1580 = vmatprep.subr.bf16.mxu1 %v1760_v1 }
 0x4e8   :  { %1581 = vmatpush3.bf16.msra.mxu1 %v1850_v12 }
 0x4e9   :  { %1582 = vmatprep.subr.bf16.mxu1 %v1760_v1 }
 0x4ec   :  { %1583 = vmatpush3.bf16.msra.mxu1 %v1856_v13 }
 0x4ed   :  { %1584 = vmatprep.subr.bf16.mxu1 %v1760_v1 }
 0x4f0   :  { %1585 = vmatpush3.bf16.msra.mxu1 %v1860_v14 }
 0x4f1   :  { %1586 = vmatprep.subr.bf16.mxu1 %v1760_v1 }
 0x4f4   :  { %1587 = vmatpush3.bf16.msra.mxu1 %v1864_v15  ;;  %v1114_v15 = vld [vmem:[#allocation6 + $0x68] sm:$0xff] }
 0x4f5   :  { %1592 = vmatprep.subr.mxu1 %v1760_v1 }
 0x58f   :  { %v791_v2 = vpop.f32.mrf.mxu1 }
 0x590   :  { %v867_v3 = vadd.f32 %v866_v31, %v791_v2 }
 0x591   :  { %v1528_v4 = vpop.f32.mrf.mxu1 }
 0x592   :  { %1682 = vtanh.f32 %v867_v3 }
 0x593   :  { %v794_v6 = vpop.f32.mrf.mxu1 }
 0x595   :  { %v1529_v10 = vpop.f32.mrf.mxu1 }
 0x597   :  { %v981_v13 = vpop.f32.mrf.mxu1 }
 0x599   :  { %v1571_v14 = vpop.f32.mrf.mxu1 }
 0x59f   :  { %v1683_v12 = vpop.eup %1682 }
 0x5a0   :  { %v871_v36 = vpack.c.bf16 %v1683_v12, %v1683_v12 }
 0x5a2   :  { %1558 = vmatmul.mubr.bf16.vlgmr.msra.gmra.mxu0 %v871_v36 }
 0x5a3   :  { %1635 = vmatprep.mubr.msk.f32.mxu0 %vm1761_vm0, %v1760_v1  ;;  %1604 = vmatpush3.msra.mxu0 %v1116_v37 }
 0x5a4   :  { %1605 = vmatprep.subr.mxu0 %v1760_v1 }
 0x5a5   :  { %1606 = vmatpush3.msra.mxu0 %v1115_v38 }
 0x5a6   :  { %1607 = vmatprep.subr.mxu0 %v1760_v1 }
 0x5a7   :  { %1608 = vmatpush3.msra.mxu0 %v1114_v15 }
 0x5a8   :  { %1609 = vmatprep.subr.mxu0 %v1760_v1 }
 0x662   :  { %v906_v39 = vpop.f32.mrf.mxu0 }
 0x663   :  { %v982_v40 = vadd.f32 %v981_v13, %v906_v39 }
 0x664   :  { %v1559_v41 = vpop.f32.mrf.mxu0 }
 0x665   :  { %1684 = vtanh.f32 %v982_v40 }
 0x666   :  { %v909_v42 = vpop.f32.mrf.mxu0 }
 0x668   :  { %v1560_v43 = vpop.f32.mrf.mxu0 }
 0x672   :  { %v1685_v44 = vpop.eup %1684 }
 0x673   :  { %v986_v45 = vpack.c.bf16 %v1685_v44, %v1685_v44 }
 0x675   :  { %1589 = vmatmul.mubr.bf16.vlgmr.msra.gmra.mxu1 %v986_v45 }
 0x676   :  { %1593 = vmatpush3.msra.mxu1 %v1831_v7  ;;  %1600 = vmatprep.mubr.msk.f32.mxu1 %vm1761_vm0, %v1760_v1  ;;  %v1113_v7 = vld [vmem:[#allocation6 + $0x60] sm:$0xff] }
 0x677   :  { %1594 = vmatprep.subr.mxu1 %v1760_v1  ;;  %1610 = vmatpush3.msra.mxu0 %v1113_v7 }
 0x678   :  { %1595 = vmatpush3.msra.mxu1 %v1833_v8  ;;  %1611 = vmatprep.subr.mxu0 %v1760_v1  ;;  %v1111_v8 = vld [vmem:[#allocation6 + $0x50] sm:$0xff] }
 0x679   :  { %1596 = vmatprep.subr.mxu1 %v1760_v1  ;;  %1612 = vmatpush3.msra.mxu0 %v1112_v48 }
 0x67a   :  { %1597 = vmatpush3.msra.mxu1 %v1837_v9  ;;  %1613 = vmatprep.subr.mxu0 %v1760_v1  ;;  %v1110_v9 = vld [vmem:[#allocation6 + $0x48] sm:$0xff] }
 0x67b   :  { %1598 = vmatprep.subr.mxu1 %v1760_v1  ;;  %1614 = vmatpush3.msra.mxu0 %v1111_v8 }
 0x67c   :  { %1599 = vmatpush3.msra.mxu1 %v1845_v11  ;;  %1615 = vmatprep.subr.mxu0 %v1760_v1  ;;  %v1108_v11 = vld [vmem:[#allocation6 + $0x38] sm:$0xff] }
 0x67d   :  { %1601 = vmatmul.mubr.msk.f32.vlgmr.msra.gmra.mxu1 %vm221_vm1, %v1208_v47  ;;  %1616 = vmatpush3.msra.mxu0 %v1110_v9 }
 0x67e   :  { %1617 = vmatprep.subr.mxu0 %v1760_v1 }
 0x67f   :  { %1618 = vmatpush3.msra.mxu0 %v1109_v17 }
 0x680   :  { %1619 = vmatprep.subr.mxu0 %v1760_v1 }
 0x681   :  { %1620 = vmatpush3.msra.mxu0 %v1108_v11 }
 0x682   :  { %1621 = vmatprep.subr.mxu0 %v1760_v1 }
 0x683   :  { %1622 = vmatpush3.msra.mxu0 %v1107_v49 }
 0x684   :  { %1623 = vmatprep.subr.mxu0 %v1760_v1 }
 0x685   :  { %1624 = vmatpush3.msra.mxu0 %v1106_v50 }
 0x686   :  { %1625 = vmatprep.subr.mxu0 %v1760_v1 }
 0x687   :  { %1626 = vmatpush3.msra.mxu0 %v1105_v51 }
 0x688   :  { %1627 = vmatprep.subr.mxu0 %v1760_v1 }
 0x689   :  { %1628 = vmatpush3.msra.mxu0 %v1104_v52 }
 0x68a   :  { %1629 = vmatprep.subr.mxu0 %v1760_v1 }
 0x68b   :  { %1630 = vmatpush3.msra.mxu0 %v1103_v53 }
 0x68c   :  { %1631 = vmatprep.subr.mxu0 %v1760_v1 }
 0x68d   :  { %1632 = vmatpush3.msra.mxu0 %v1102_v54 }
 0x68e   :  { %1633 = vmatprep.subr.mxu0 %v1760_v1 }
 0x68f   :  { %1634 = vmatpush3.msra.mxu0 %v1101_v55 }
 0x735   :  { %v1021_v56 = vpop.f32.mrf.mxu1 }
 0x737   :  { %v1590_v57 = vpop.f32.mrf.mxu1 }
 0x739   :  { %v1024_v58 = vpop.f32.mrf.mxu1 }
 0x73b   :  { %v1591_v59 = vpop.f32.mrf.mxu1 }
 0x73d   :  { %v1096_v60 = vpop.f32.mrf.mxu1 }
 0x73e   :  { %v1097_v61 = vadd.f32 %v1096_v60, %v1021_v56 }
 0x73f   :  { %v1602_v62 = vpop.f32.mrf.mxu1 }
 0x740   :  { %1686 = vtanh.f32 %v1097_v61 }
 0x74d   :  { %v1687_v63 = vpop.eup %1686 }
 0x74e   :  { %1636 = vmatmul.mubr.f32.vlgmr.msra.gmra.mxu0 %v1687_v63 }
 0x80e   :  { %v1190_v5 = vpop.f32.mrf.mxu0 }
 0x80f   :  { %v1191_v16 = vadd.f32 %v1225_v0, %v1190_v5 }
 0x810   :  { %v1637_v18 = vpop.f32.mrf.mxu0 }
 0x811   :  { %1194 = vst [vmem:[%s2124_s5] sm:$0xff] %v1191_v16 }
 0x812   :  { %1199 = vsyncpa [#allocation3], 1 }
 0x813   :  { %1200 = vsyncpa [#allocation5], 1 }

</bundles_post_ra>
